<compile_context>
chip_gen: v5e
topology: v5e:2x2
jax: 0.10.0
libtpu: 0.0.40
codegen_flags: <defaults>
</compile_context>

<pallas_src>
import functools

import jax
import jax.numpy as jnp
from jax.experimental import pallas as pl
from jax.experimental.pallas import tpu as pltpu

LANE = 128
SUBLANE = 8


def _round_up(x, m):
    return (x + m - 1) // m * m


def mlp_kernel(x_ref, p_ref, o_ref, *, n_hidden):
    """One batch tile of Linear(H,1)(ReLU(Linear(1,H)(x))).

    x_ref: (R, 128) VMEM  -- batch elements along lanes, R row-groups per step
    p_ref: (4, H)   SMEM  -- rows: w1, b1, w2, [b2, 0, ...]; scalar-indexed
    o_ref: (R, 128) VMEM  -- dense minimal-byte output, same layout as x
    """
    x = x_ref[...].astype(jnp.float32)          # (R, 128), accumulate in f32
    acc = jnp.zeros_like(x) + p_ref[3, 0]       # start from the output bias b2
    # n_hidden is small and static: unroll.  Each step is a scalar-broadcast
    # FMA + ReLU + FMA on the VPU; no hidden-dim padding, no big temporaries.
    for h in range(n_hidden):
        w1 = p_ref[0, h]
        b1 = p_ref[1, h]
        w2 = p_ref[2, h]
        acc = acc + w2 * jnp.maximum(x * w1 + b1, 0.0)
    o_ref[...] = acc.astype(o_ref.dtype)


@functools.partial(jax.jit, static_argnames=("tile_rows",))
def net_forward(x, w1, b1, w2, b2, *, tile_rows=128):
    """Forward pass of Net.

    x: (N, 1); w1: (1, H); b1: (1, H) or (H,); w2: (H, 1); b2: (1, 1) or (1,).
    Returns (N, 1) in x.dtype.
    """
    n, f = x.shape
    assert f == 1, "kernel specialized to n_feature == 1"
    h = w1.shape[1]
    assert w2.shape == (h, 1), "kernel specialized to n_output == 1"
    # TODO(synk): generalize to n_feature > 1 / n_output > 1 (route those
    # matmuls through the MXU); this kernel follows the spec's F=1, O=1 shapes.

    dtype = x.dtype
    n_pad = _round_up(n, LANE)
    n_rows = n_pad // LANE

    # Batch on lanes: row r holds elements r*128 .. r*128+127 (padding discarded).
    x_rows = jnp.zeros((n_pad,), dtype).at[:n].set(x[:, 0]).reshape(n_rows, LANE)

    # One small f32 parameter table (lives in SMEM): rows w1, b1, w2, [b2, 0...].
    p = jnp.zeros((4, h), jnp.float32)
    p = p.at[0, :].set(w1.reshape(-1).astype(jnp.float32))
    p = p.at[1, :].set(b1.reshape(-1).astype(jnp.float32))
    p = p.at[2, :].set(w2.reshape(-1).astype(jnp.float32))
    p = p.at[3, 0].set(b2.reshape(-1)[0].astype(jnp.float32))

    # Tile the batch row-groups. Tiles are 8-sublane aligned (or cover the whole
    # array); for larger batches cap the tile so there are >= 2 grid steps and
    # v7x's two TensorCores both get work under "parallel" semantics.
    if n_rows <= 2 * SUBLANE:
        tr = n_rows
    else:
        tr = min(_round_up(tile_rows, SUBLANE),
                 _round_up(pl.cdiv(n_rows, 2), SUBLANE))
    grid = (pl.cdiv(n_rows, tr),)

    itemsize = jnp.dtype(dtype).itemsize
    cost = pl.CostEstimate(
        flops=5 * n * h,
        transcendentals=0,
        bytes_accessed=itemsize * (2 * x_rows.size) + 4 * p.size,
    )

    out_rows = pl.pallas_call(
        functools.partial(mlp_kernel, n_hidden=h),
        out_shape=jax.ShapeDtypeStruct((n_rows, LANE), dtype),
        grid_spec=pltpu.PrefetchScalarGridSpec(
            num_scalar_prefetch=0,
            grid=grid,
            in_specs=[
                pl.BlockSpec((tr, LANE), lambda i: (i, 0)),           # x: batch-tiled
                pl.BlockSpec(memory_space=pltpu.MemorySpace.SMEM),    # params: resident
            ],
            out_specs=pl.BlockSpec((tr, LANE), lambda i: (i, 0)),
        ),
        compiler_params=pltpu.CompilerParams(
            dimension_semantics=("parallel",),
        ),
        cost_estimate=cost,
    )(x_rows, p)

    # Undo the lane packing; drop padded batch elements only (N*4 B of output).
    return out_rows.reshape(n_pad, 1)[:n]


def init_params(key, n_feature, n_hidden, n_output, dtype=jnp.float32):
    """Deterministic init mimicking torch.nn.Linear: U(-1/sqrt(fan_in), 1/sqrt(fan_in))."""
    k1, k2, k3, k4 = jax.random.split(key, 4)
    bound1 = 1.0 / jnp.sqrt(jnp.array(n_feature, dtype))
    bound2 = 1.0 / jnp.sqrt(jnp.array(n_hidden, dtype))
    w1 = jax.random.uniform(k1, (n_feature, n_hidden), dtype, -bound1, bound1)
    b1 = jax.random.uniform(k2, (1, n_hidden), dtype, -bound1, bound1)
    w2 = jax.random.uniform(k3, (n_hidden, n_output), dtype, -bound2, bound2)
    b2 = jax.random.uniform(k4, (1, n_output), dtype, -bound2, bound2)
    return w1, b1, w2, b2


if __name__ == "__main__":
    # Matches the reference script: x = unsqueeze(linspace(-1, 1, 100), dim=1) -> (100, 1)
    n_feature, n_hidden, n_output = 1, 32, 1
    x = jnp.expand_dims(jnp.linspace(-1.0, 1.0, 100, dtype=jnp.float32), axis=1)

    key = jax.random.PRNGKey(0)
    w1, b1, w2, b2 = init_params(key, n_feature, n_hidden, n_output)

    out = jax.block_until_ready(net_forward(x, w1, b1, w2, b2))

    # Cross-check against a pure-JAX reference of the same forward pass.
    ref = jnp.maximum(x @ w1 + b1, 0.0) @ w2 + b2
    assert out.shape == (100, 1)
    assert jnp.allclose(out, ref, atol=1e-5, rtol=1e-5)

    print("KERNEL_OK")
</pallas_src>

<mosaic_0001>
module attributes {stable_mosaic.version = 11 : i64} {
  func.func @mlp_kernel(%arg0: i32, %arg1: memref<1x128xf32, #tpu.memory_space<vmem>>, %arg2: memref<4x32xf32, #tpu.memory_space<smem>>, %arg3: memref<1x128xf32, #tpu.memory_space<vmem>>) attributes {dimension_semantics = [#tpu.dimension_semantics<parallel>], iteration_bounds = array<i64: 1>, scalar_prefetch = 0 : i64, scratch_operands = 0 : i64, tpu.core_type = #tpu.core_type<tc>, window_params = [{transform_indices = @transform_0, window_bounds = array<i64: 1, 128>}, {transform_indices = @transform_1, window_bounds = array<i64: 4, 32>}, {transform_indices = @transform_2, window_bounds = array<i64: 1, 128>}]} {
    %c0 = arith.constant 0 : index
    %c0_0 = arith.constant 0 : index
    %0 = vector.load %arg1[%c0, %c0_0] : memref<1x128xf32, #tpu.memory_space<vmem>>, vector<1x128xf32>
    %cst = arith.constant 0.000000e+00 : f32
    %1 = vector.broadcast %cst : f32 to vector<1x128xf32>
    %c3 = arith.constant 3 : index
    %c0_1 = arith.constant 0 : index
    %2 = memref.load %arg2[%c3, %c0_1] : memref<4x32xf32, #tpu.memory_space<smem>>
    %3 = vector.broadcast %2 : f32 to vector<1x128xf32>
    %4 = arith.addf %1, %3 : vector<1x128xf32>
    %c0_2 = arith.constant 0 : index
    %c0_3 = arith.constant 0 : index
    %5 = memref.load %arg2[%c0_2, %c0_3] : memref<4x32xf32, #tpu.memory_space<smem>>
    %c1 = arith.constant 1 : index
    %c0_4 = arith.constant 0 : index
    %6 = memref.load %arg2[%c1, %c0_4] : memref<4x32xf32, #tpu.memory_space<smem>>
    %c2 = arith.constant 2 : index
    %c0_5 = arith.constant 0 : index
    %7 = memref.load %arg2[%c2, %c0_5] : memref<4x32xf32, #tpu.memory_space<smem>>
    %8 = vector.broadcast %5 : f32 to vector<1x128xf32>
    %9 = arith.mulf %0, %8 : vector<1x128xf32>
    %10 = vector.broadcast %6 : f32 to vector<1x128xf32>
    %11 = arith.addf %9, %10 : vector<1x128xf32>
    %cst_6 = arith.constant 0.000000e+00 : f32
    %12 = vector.broadcast %cst_6 : f32 to vector<1x128xf32>
    %13 = arith.maximumf %11, %12 : vector<1x128xf32>
    %14 = vector.broadcast %7 : f32 to vector<1x128xf32>
    %15 = arith.mulf %14, %13 : vector<1x128xf32>
    %16 = arith.addf %4, %15 : vector<1x128xf32>
    %c0_7 = arith.constant 0 : index
    %c1_8 = arith.constant 1 : index
    %17 = memref.load %arg2[%c0_7, %c1_8] : memref<4x32xf32, #tpu.memory_space<smem>>
    %c1_9 = arith.constant 1 : index
    %c1_10 = arith.constant 1 : index
    %18 = memref.load %arg2[%c1_9, %c1_10] : memref<4x32xf32, #tpu.memory_space<smem>>
    %c2_11 = arith.constant 2 : index
    %c1_12 = arith.constant 1 : index
    %19 = memref.load %arg2[%c2_11, %c1_12] : memref<4x32xf32, #tpu.memory_space<smem>>
    %20 = vector.broadcast %17 : f32 to vector<1x128xf32>
    %21 = arith.mulf %0, %20 : vector<1x128xf32>
    %22 = vector.broadcast %18 : f32 to vector<1x128xf32>
    %23 = arith.addf %21, %22 : vector<1x128xf32>
    %cst_13 = arith.constant 0.000000e+00 : f32
    %24 = vector.broadcast %cst_13 : f32 to vector<1x128xf32>
    %25 = arith.maximumf %23, %24 : vector<1x128xf32>
    %26 = vector.broadcast %19 : f32 to vector<1x128xf32>
    %27 = arith.mulf %26, %25 : vector<1x128xf32>
    %28 = arith.addf %16, %27 : vector<1x128xf32>
    %c0_14 = arith.constant 0 : index
    %c2_15 = arith.constant 2 : index
    %29 = memref.load %arg2[%c0_14, %c2_15] : memref<4x32xf32, #tpu.memory_space<smem>>
    %c1_16 = arith.constant 1 : index
    %c2_17 = arith.constant 2 : index
    %30 = memref.load %arg2[%c1_16, %c2_17] : memref<4x32xf32, #tpu.memory_space<smem>>
    %c2_18 = arith.constant 2 : index
    %c2_19 = arith.constant 2 : index
    %31 = memref.load %arg2[%c2_18, %c2_19] : memref<4x32xf32, #tpu.memory_space<smem>>
    %32 = vector.broadcast %29 : f32 to vector<1x128xf32>
    %33 = arith.mulf %0, %32 : vector<1x128xf32>
    %34 = vector.broadcast %30 : f32 to vector<1x128xf32>
    %35 = arith.addf %33, %34 : vector<1x128xf32>
    %cst_20 = arith.constant 0.000000e+00 : f32
    %36 = vector.broadcast %cst_20 : f32 to vector<1x128xf32>
    %37 = arith.maximumf %35, %36 : vector<1x128xf32>
    %38 = vector.broadcast %31 : f32 to vector<1x128xf32>
    %39 = arith.mulf %38, %37 : vector<1x128xf32>
    %40 = arith.addf %28, %39 : vector<1x128xf32>
    %c0_21 = arith.constant 0 : index
    %c3_22 = arith.constant 3 : index
    %41 = memref.load %arg2[%c0_21, %c3_22] : memref<4x32xf32, #tpu.memory_space<smem>>
    %c1_23 = arith.constant 1 : index
    %c3_24 = arith.constant 3 : index
    %42 = memref.load %arg2[%c1_23, %c3_24] : memref<4x32xf32, #tpu.memory_space<smem>>
    %c2_25 = arith.constant 2 : index
    %c3_26 = arith.constant 3 : index
    %43 = memref.load %arg2[%c2_25, %c3_26] : memref<4x32xf32, #tpu.memory_space<smem>>
    %44 = vector.broadcast %41 : f32 to vector<1x128xf32>
    %45 = arith.mulf %0, %44 : vector<1x128xf32>
    %46 = vector.broadcast %42 : f32 to vector<1x128xf32>
    %47 = arith.addf %45, %46 : vector<1x128xf32>
    %cst_27 = arith.constant 0.000000e+00 : f32
    %48 = vector.broadcast %cst_27 : f32 to vector<1x128xf32>
    %49 = arith.maximumf %47, %48 : vector<1x128xf32>
    %50 = vector.broadcast %43 : f32 to vector<1x128xf32>
    %51 = arith.mulf %50, %49 : vector<1x128xf32>
    %52 = arith.addf %40, %51 : vector<1x128xf32>
    %c0_28 = arith.constant 0 : index
    %c4 = arith.constant 4 : index
    %53 = memref.load %arg2[%c0_28, %c4] : memref<4x32xf32, #tpu.memory_space<smem>>
    %c1_29 = arith.constant 1 : index
    %c4_30 = arith.constant 4 : index
    %54 = memref.load %arg2[%c1_29, %c4_30] : memref<4x32xf32, #tpu.memory_space<smem>>
    %c2_31 = arith.constant 2 : index
    %c4_32 = arith.constant 4 : index
    %55 = memref.load %arg2[%c2_31, %c4_32] : memref<4x32xf32, #tpu.memory_space<smem>>
    %56 = vector.broadcast %53 : f32 to vector<1x128xf32>
    %57 = arith.mulf %0, %56 : vector<1x128xf32>
    %58 = vector.broadcast %54 : f32 to vector<1x128xf32>
    %59 = arith.addf %57, %58 : vector<1x128xf32>
    %cst_33 = arith.constant 0.000000e+00 : f32
    %60 = vector.broadcast %cst_33 : f32 to vector<1x128xf32>
    %61 = arith.maximumf %59, %60 : vector<1x128xf32>
    %62 = vector.broadcast %55 : f32 to vector<1x128xf32>
    %63 = arith.mulf %62, %61 : vector<1x128xf32>
    %64 = arith.addf %52, %63 : vector<1x128xf32>
    %c0_34 = arith.constant 0 : index
    %c5 = arith.constant 5 : index
    %65 = memref.load %arg2[%c0_34, %c5] : memref<4x32xf32, #tpu.memory_space<smem>>
    %c1_35 = arith.constant 1 : index
    %c5_36 = arith.constant 5 : index
    %66 = memref.load %arg2[%c1_35, %c5_36] : memref<4x32xf32, #tpu.memory_space<smem>>
    %c2_37 = arith.constant 2 : index
    %c5_38 = arith.constant 5 : index
    %67 = memref.load %arg2[%c2_37, %c5_38] : memref<4x32xf32, #tpu.memory_space<smem>>
    %68 = vector.broadcast %65 : f32 to vector<1x128xf32>
    %69 = arith.mulf %0, %68 : vector<1x128xf32>
    %70 = vector.broadcast %66 : f32 to vector<1x128xf32>
    %71 = arith.addf %69, %70 : vector<1x128xf32>
    %cst_39 = arith.constant 0.000000e+00 : f32
    %72 = vector.broadcast %cst_39 : f32 to vector<1x128xf32>
    %73 = arith.maximumf %71, %72 : vector<1x128xf32>
    %74 = vector.broadcast %67 : f32 to vector<1x128xf32>
    %75 = arith.mulf %74, %73 : vector<1x128xf32>
    %76 = arith.addf %64, %75 : vector<1x128xf32>
    %c0_40 = arith.constant 0 : index
    %c6 = arith.constant 6 : index
    %77 = memref.load %arg2[%c0_40, %c6] : memref<4x32xf32, #tpu.memory_space<smem>>
    %c1_41 = arith.constant 1 : index
    %c6_42 = arith.constant 6 : index
    %78 = memref.load %arg2[%c1_41, %c6_42] : memref<4x32xf32, #tpu.memory_space<smem>>
    %c2_43 = arith.constant 2 : index
    %c6_44 = arith.constant 6 : index
    %79 = memref.load %arg2[%c2_43, %c6_44] : memref<4x32xf32, #tpu.memory_space<smem>>
    %80 = vector.broadcast %77 : f32 to vector<1x128xf32>
    %81 = arith.mulf %0, %80 : vector<1x128xf32>
    %82 = vector.broadcast %78 : f32 to vector<1x128xf32>
    %83 = arith.addf %81, %82 : vector<1x128xf32>
    %cst_45 = arith.constant 0.000000e+00 : f32
    %84 = vector.broadcast %cst_45 : f32 to vector<1x128xf32>
    %85 = arith.maximumf %83, %84 : vector<1x128xf32>
    %86 = vector.broadcast %79 : f32 to vector<1x128xf32>
    %87 = arith.mulf %86, %85 : vector<1x128xf32>
    %88 = arith.addf %76, %87 : vector<1x128xf32>
    %c0_46 = arith.constant 0 : index
    %c7 = arith.constant 7 : index
    %89 = memref.load %arg2[%c0_46, %c7] : memref<4x32xf32, #tpu.memory_space<smem>>
    %c1_47 = arith.constant 1 : index
    %c7_48 = arith.constant 7 : index
    %90 = memref.load %arg2[%c1_47, %c7_48] : memref<4x32xf32, #tpu.memory_space<smem>>
    %c2_49 = arith.constant 2 : index
    %c7_50 = arith.constant 7 : index
    %91 = memref.load %arg2[%c2_49, %c7_50] : memref<4x32xf32, #tpu.memory_space<smem>>
    %92 = vector.broadcast %89 : f32 to vector<1x128xf32>
    %93 = arith.mulf %0, %92 : vector<1x128xf32>
    %94 = vector.broadcast %90 : f32 to vector<1x128xf32>
    %95 = arith.addf %93, %94 : vector<1x128xf32>
    %cst_51 = arith.constant 0.000000e+00 : f32
    %96 = vector.broadcast %cst_51 : f32 to vector<1x128xf32>
    %97 = arith.maximumf %95, %96 : vector<1x128xf32>
    %98 = vector.broadcast %91 : f32 to vector<1x128xf32>
    %99 = arith.mulf %98, %97 : vector<1x128xf32>
    %100 = arith.addf %88, %99 : vector<1x128xf32>
    %c0_52 = arith.constant 0 : index
    %c8 = arith.constant 8 : index
    %101 = memref.load %arg2[%c0_52, %c8] : memref<4x32xf32, #tpu.memory_space<smem>>
    %c1_53 = arith.constant 1 : index
    %c8_54 = arith.constant 8 : index
    %102 = memref.load %arg2[%c1_53, %c8_54] : memref<4x32xf32, #tpu.memory_space<smem>>
    %c2_55 = arith.constant 2 : index
    %c8_56 = arith.constant 8 : index
    %103 = memref.load %arg2[%c2_55, %c8_56] : memref<4x32xf32, #tpu.memory_space<smem>>
    %104 = vector.broadcast %101 : f32 to vector<1x128xf32>
    %105 = arith.mulf %0, %104 : vector<1x128xf32>
    %106 = vector.broadcast %102 : f32 to vector<1x128xf32>
    %107 = arith.addf %105, %106 : vector<1x128xf32>
    %cst_57 = arith.constant 0.000000e+00 : f32
    %108 = vector.broadcast %cst_57 : f32 to vector<1x128xf32>
    %109 = arith.maximumf %107, %108 : vector<1x128xf32>
    %110 = vector.broadcast %103 : f32 to vector<1x128xf32>
    %111 = arith.mulf %110, %109 : vector<1x128xf32>
    %112 = arith.addf %100, %111 : vector<1x128xf32>
    %c0_58 = arith.constant 0 : index
    %c9 = arith.constant 9 : index
    %113 = memref.load %arg2[%c0_58, %c9] : memref<4x32xf32, #tpu.memory_space<smem>>
    %c1_59 = arith.constant 1 : index
    %c9_60 = arith.constant 9 : index
    %114 = memref.load %arg2[%c1_59, %c9_60] : memref<4x32xf32, #tpu.memory_space<smem>>
    %c2_61 = arith.constant 2 : index
    %c9_62 = arith.constant 9 : index
    %115 = memref.load %arg2[%c2_61, %c9_62] : memref<4x32xf32, #tpu.memory_space<smem>>
    %116 = vector.broadcast %113 : f32 to vector<1x128xf32>
    %117 = arith.mulf %0, %116 : vector<1x128xf32>
    %118 = vector.broadcast %114 : f32 to vector<1x128xf32>
    %119 = arith.addf %117, %118 : vector<1x128xf32>
    %cst_63 = arith.constant 0.000000e+00 : f32
    %120 = vector.broadcast %cst_63 : f32 to vector<1x128xf32>
    %121 = arith.maximumf %119, %120 : vector<1x128xf32>
    %122 = vector.broadcast %115 : f32 to vector<1x128xf32>
    %123 = arith.mulf %122, %121 : vector<1x128xf32>
    %124 = arith.addf %112, %123 : vector<1x128xf32>
    %c0_64 = arith.constant 0 : index
    %c10 = arith.constant 10 : index
    %125 = memref.load %arg2[%c0_64, %c10] : memref<4x32xf32, #tpu.memory_space<smem>>
    %c1_65 = arith.constant 1 : index
    %c10_66 = arith.constant 10 : index
    %126 = memref.load %arg2[%c1_65, %c10_66] : memref<4x32xf32, #tpu.memory_space<smem>>
    %c2_67 = arith.constant 2 : index
    %c10_68 = arith.constant 10 : index
    %127 = memref.load %arg2[%c2_67, %c10_68] : memref<4x32xf32, #tpu.memory_space<smem>>
    %128 = vector.broadcast %125 : f32 to vector<1x128xf32>
    %129 = arith.mulf %0, %128 : vector<1x128xf32>
    %130 = vector.broadcast %126 : f32 to vector<1x128xf32>
    %131 = arith.addf %129, %130 : vector<1x128xf32>
    %cst_69 = arith.constant 0.000000e+00 : f32
    %132 = vector.broadcast %cst_69 : f32 to vector<1x128xf32>
    %133 = arith.maximumf %131, %132 : vector<1x128xf32>
    %134 = vector.broadcast %127 : f32 to vector<1x128xf32>
    %135 = arith.mulf %134, %133 : vector<1x128xf32>
    %136 = arith.addf %124, %135 : vector<1x128xf32>
    %c0_70 = arith.constant 0 : index
    %c11 = arith.constant 11 : index
    %137 = memref.load %arg2[%c0_70, %c11] : memref<4x32xf32, #tpu.memory_space<smem>>
    %c1_71 = arith.constant 1 : index
    %c11_72 = arith.constant 11 : index
    %138 = memref.load %arg2[%c1_71, %c11_72] : memref<4x32xf32, #tpu.memory_space<smem>>
    %c2_73 = arith.constant 2 : index
    %c11_74 = arith.constant 11 : index
    %139 = memref.load %arg2[%c2_73, %c11_74] : memref<4x32xf32, #tpu.memory_space<smem>>
    %140 = vector.broadcast %137 : f32 to vector<1x128xf32>
    %141 = arith.mulf %0, %140 : vector<1x128xf32>
    %142 = vector.broadcast %138 : f32 to vector<1x128xf32>
    %143 = arith.addf %141, %142 : vector<1x128xf32>
    %cst_75 = arith.constant 0.000000e+00 : f32
    %144 = vector.broadcast %cst_75 : f32 to vector<1x128xf32>
    %145 = arith.maximumf %143, %144 : vector<1x128xf32>
    %146 = vector.broadcast %139 : f32 to vector<1x128xf32>
    %147 = arith.mulf %146, %145 : vector<1x128xf32>
    %148 = arith.addf %136, %147 : vector<1x128xf32>
    %c0_76 = arith.constant 0 : index
    %c12 = arith.constant 12 : index
    %149 = memref.load %arg2[%c0_76, %c12] : memref<4x32xf32, #tpu.memory_space<smem>>
    %c1_77 = arith.constant 1 : index
    %c12_78 = arith.constant 12 : index
    %150 = memref.load %arg2[%c1_77, %c12_78] : memref<4x32xf32, #tpu.memory_space<smem>>
    %c2_79 = arith.constant 2 : index
    %c12_80 = arith.constant 12 : index
    %151 = memref.load %arg2[%c2_79, %c12_80] : memref<4x32xf32, #tpu.memory_space<smem>>
    %152 = vector.broadcast %149 : f32 to vector<1x128xf32>
    %153 = arith.mulf %0, %152 : vector<1x128xf32>
    %154 = vector.broadcast %150 : f32 to vector<1x128xf32>
    %155 = arith.addf %153, %154 : vector<1x128xf32>
    %cst_81 = arith.constant 0.000000e+00 : f32
    %156 = vector.broadcast %cst_81 : f32 to vector<1x128xf32>
    %157 = arith.maximumf %155, %156 : vector<1x128xf32>
    %158 = vector.broadcast %151 : f32 to vector<1x128xf32>
    %159 = arith.mulf %158, %157 : vector<1x128xf32>
    %160 = arith.addf %148, %159 : vector<1x128xf32>
    %c0_82 = arith.constant 0 : index
    %c13 = arith.constant 13 : index
    %161 = memref.load %arg2[%c0_82, %c13] : memref<4x32xf32, #tpu.memory_space<smem>>
    %c1_83 = arith.constant 1 : index
    %c13_84 = arith.constant 13 : index
    %162 = memref.load %arg2[%c1_83, %c13_84] : memref<4x32xf32, #tpu.memory_space<smem>>
    %c2_85 = arith.constant 2 : index
    %c13_86 = arith.constant 13 : index
    %163 = memref.load %arg2[%c2_85, %c13_86] : memref<4x32xf32, #tpu.memory_space<smem>>
    %164 = vector.broadcast %161 : f32 to vector<1x128xf32>
    %165 = arith.mulf %0, %164 : vector<1x128xf32>
    %166 = vector.broadcast %162 : f32 to vector<1x128xf32>
    %167 = arith.addf %165, %166 : vector<1x128xf32>
    %cst_87 = arith.constant 0.000000e+00 : f32
    %168 = vector.broadcast %cst_87 : f32 to vector<1x128xf32>
    %169 = arith.maximumf %167, %168 : vector<1x128xf32>
    %170 = vector.broadcast %163 : f32 to vector<1x128xf32>
    %171 = arith.mulf %170, %169 : vector<1x128xf32>
    %172 = arith.addf %160, %171 : vector<1x128xf32>
    %c0_88 = arith.constant 0 : index
    %c14 = arith.constant 14 : index
    %173 = memref.load %arg2[%c0_88, %c14] : memref<4x32xf32, #tpu.memory_space<smem>>
    %c1_89 = arith.constant 1 : index
    %c14_90 = arith.constant 14 : index
    %174 = memref.load %arg2[%c1_89, %c14_90] : memref<4x32xf32, #tpu.memory_space<smem>>
    %c2_91 = arith.constant 2 : index
    %c14_92 = arith.constant 14 : index
    %175 = memref.load %arg2[%c2_91, %c14_92] : memref<4x32xf32, #tpu.memory_space<smem>>
    %176 = vector.broadcast %173 : f32 to vector<1x128xf32>
    %177 = arith.mulf %0, %176 : vector<1x128xf32>
    %178 = vector.broadcast %174 : f32 to vector<1x128xf32>
    %179 = arith.addf %177, %178 : vector<1x128xf32>
    %cst_93 = arith.constant 0.000000e+00 : f32
    %180 = vector.broadcast %cst_93 : f32 to vector<1x128xf32>
    %181 = arith.maximumf %179, %180 : vector<1x128xf32>
    %182 = vector.broadcast %175 : f32 to vector<1x128xf32>
    %183 = arith.mulf %182, %181 : vector<1x128xf32>
    %184 = arith.addf %172, %183 : vector<1x128xf32>
    %c0_94 = arith.constant 0 : index
    %c15 = arith.constant 15 : index
    %185 = memref.load %arg2[%c0_94, %c15] : memref<4x32xf32, #tpu.memory_space<smem>>
    %c1_95 = arith.constant 1 : index
    %c15_96 = arith.constant 15 : index
    %186 = memref.load %arg2[%c1_95, %c15_96] : memref<4x32xf32, #tpu.memory_space<smem>>
    %c2_97 = arith.constant 2 : index
    %c15_98 = arith.constant 15 : index
    %187 = memref.load %arg2[%c2_97, %c15_98] : memref<4x32xf32, #tpu.memory_space<smem>>
    %188 = vector.broadcast %185 : f32 to vector<1x128xf32>
    %189 = arith.mulf %0, %188 : vector<1x128xf32>
    %190 = vector.broadcast %186 : f32 to vector<1x128xf32>
    %191 = arith.addf %189, %190 : vector<1x128xf32>
    %cst_99 = arith.constant 0.000000e+00 : f32
    %192 = vector.broadcast %cst_99 : f32 to vector<1x128xf32>
    %193 = arith.maximumf %191, %192 : vector<1x128xf32>
    %194 = vector.broadcast %187 : f32 to vector<1x128xf32>
    %195 = arith.mulf %194, %193 : vector<1x128xf32>
    %196 = arith.addf %184, %195 : vector<1x128xf32>
    %c0_100 = arith.constant 0 : index
    %c16 = arith.constant 16 : index
    %197 = memref.load %arg2[%c0_100, %c16] : memref<4x32xf32, #tpu.memory_space<smem>>
    %c1_101 = arith.constant 1 : index
    %c16_102 = arith.constant 16 : index
    %198 = memref.load %arg2[%c1_101, %c16_102] : memref<4x32xf32, #tpu.memory_space<smem>>
    %c2_103 = arith.constant 2 : index
    %c16_104 = arith.constant 16 : index
    %199 = memref.load %arg2[%c2_103, %c16_104] : memref<4x32xf32, #tpu.memory_space<smem>>
    %200 = vector.broadcast %197 : f32 to vector<1x128xf32>
    %201 = arith.mulf %0, %200 : vector<1x128xf32>
    %202 = vector.broadcast %198 : f32 to vector<1x128xf32>
    %203 = arith.addf %201, %202 : vector<1x128xf32>
    %cst_105 = arith.constant 0.000000e+00 : f32
    %204 = vector.broadcast %cst_105 : f32 to vector<1x128xf32>
    %205 = arith.maximumf %203, %204 : vector<1x128xf32>
    %206 = vector.broadcast %199 : f32 to vector<1x128xf32>
    %207 = arith.mulf %206, %205 : vector<1x128xf32>
    %208 = arith.addf %196, %207 : vector<1x128xf32>
    %c0_106 = arith.constant 0 : index
    %c17 = arith.constant 17 : index
    %209 = memref.load %arg2[%c0_106, %c17] : memref<4x32xf32, #tpu.memory_space<smem>>
    %c1_107 = arith.constant 1 : index
    %c17_108 = arith.constant 17 : index
    %210 = memref.load %arg2[%c1_107, %c17_108] : memref<4x32xf32, #tpu.memory_space<smem>>
    %c2_109 = arith.constant 2 : index
    %c17_110 = arith.constant 17 : index
    %211 = memref.load %arg2[%c2_109, %c17_110] : memref<4x32xf32, #tpu.memory_space<smem>>
    %212 = vector.broadcast %209 : f32 to vector<1x128xf32>
    %213 = arith.mulf %0, %212 : vector<1x128xf32>
    %214 = vector.broadcast %210 : f32 to vector<1x128xf32>
    %215 = arith.addf %213, %214 : vector<1x128xf32>
    %cst_111 = arith.constant 0.000000e+00 : f32
    %216 = vector.broadcast %cst_111 : f32 to vector<1x128xf32>
    %217 = arith.maximumf %215, %216 : vector<1x128xf32>
    %218 = vector.broadcast %211 : f32 to vector<1x128xf32>
    %219 = arith.mulf %218, %217 : vector<1x128xf32>
    %220 = arith.addf %208, %219 : vector<1x128xf32>
    %c0_112 = arith.constant 0 : index
    %c18 = arith.constant 18 : index
    %221 = memref.load %arg2[%c0_112, %c18] : memref<4x32xf32, #tpu.memory_space<smem>>
    %c1_113 = arith.constant 1 : index
    %c18_114 = arith.constant 18 : index
    %222 = memref.load %arg2[%c1_113, %c18_114] : memref<4x32xf32, #tpu.memory_space<smem>>
    %c2_115 = arith.constant 2 : index
    %c18_116 = arith.constant 18 : index
    %223 = memref.load %arg2[%c2_115, %c18_116] : memref<4x32xf32, #tpu.memory_space<smem>>
    %224 = vector.broadcast %221 : f32 to vector<1x128xf32>
    %225 = arith.mulf %0, %224 : vector<1x128xf32>
    %226 = vector.broadcast %222 : f32 to vector<1x128xf32>
    %227 = arith.addf %225, %226 : vector<1x128xf32>
    %cst_117 = arith.constant 0.000000e+00 : f32
    %228 = vector.broadcast %cst_117 : f32 to vector<1x128xf32>
    %229 = arith.maximumf %227, %228 : vector<1x128xf32>
    %230 = vector.broadcast %223 : f32 to vector<1x128xf32>
    %231 = arith.mulf %230, %229 : vector<1x128xf32>
    %232 = arith.addf %220, %231 : vector<1x128xf32>
    %c0_118 = arith.constant 0 : index
    %c19 = arith.constant 19 : index
    %233 = memref.load %arg2[%c0_118, %c19] : memref<4x32xf32, #tpu.memory_space<smem>>
    %c1_119 = arith.constant 1 : index
    %c19_120 = arith.constant 19 : index
    %234 = memref.load %arg2[%c1_119, %c19_120] : memref<4x32xf32, #tpu.memory_space<smem>>
    %c2_121 = arith.constant 2 : index
    %c19_122 = arith.constant 19 : index
    %235 = memref.load %arg2[%c2_121, %c19_122] : memref<4x32xf32, #tpu.memory_space<smem>>
    %236 = vector.broadcast %233 : f32 to vector<1x128xf32>
    %237 = arith.mulf %0, %236 : vector<1x128xf32>
    %238 = vector.broadcast %234 : f32 to vector<1x128xf32>
    %239 = arith.addf %237, %238 : vector<1x128xf32>
    %cst_123 = arith.constant 0.000000e+00 : f32
    %240 = vector.broadcast %cst_123 : f32 to vector<1x128xf32>
    %241 = arith.maximumf %239, %240 : vector<1x128xf32>
    %242 = vector.broadcast %235 : f32 to vector<1x128xf32>
    %243 = arith.mulf %242, %241 : vector<1x128xf32>
    %244 = arith.addf %232, %243 : vector<1x128xf32>
    %c0_124 = arith.constant 0 : index
    %c20 = arith.constant 20 : index
    %245 = memref.load %arg2[%c0_124, %c20] : memref<4x32xf32, #tpu.memory_space<smem>>
    %c1_125 = arith.constant 1 : index
    %c20_126 = arith.constant 20 : index
    %246 = memref.load %arg2[%c1_125, %c20_126] : memref<4x32xf32, #tpu.memory_space<smem>>
    %c2_127 = arith.constant 2 : index
    %c20_128 = arith.constant 20 : index
    %247 = memref.load %arg2[%c2_127, %c20_128] : memref<4x32xf32, #tpu.memory_space<smem>>
    %248 = vector.broadcast %245 : f32 to vector<1x128xf32>
    %249 = arith.mulf %0, %248 : vector<1x128xf32>
    %250 = vector.broadcast %246 : f32 to vector<1x128xf32>
    %251 = arith.addf %249, %250 : vector<1x128xf32>
    %cst_129 = arith.constant 0.000000e+00 : f32
    %252 = vector.broadcast %cst_129 : f32 to vector<1x128xf32>
    %253 = arith.maximumf %251, %252 : vector<1x128xf32>
    %254 = vector.broadcast %247 : f32 to vector<1x128xf32>
    %255 = arith.mulf %254, %253 : vector<1x128xf32>
    %256 = arith.addf %244, %255 : vector<1x128xf32>
    %c0_130 = arith.constant 0 : index
    %c21 = arith.constant 21 : index
    %257 = memref.load %arg2[%c0_130, %c21] : memref<4x32xf32, #tpu.memory_space<smem>>
    %c1_131 = arith.constant 1 : index
    %c21_132 = arith.constant 21 : index
    %258 = memref.load %arg2[%c1_131, %c21_132] : memref<4x32xf32, #tpu.memory_space<smem>>
    %c2_133 = arith.constant 2 : index
    %c21_134 = arith.constant 21 : index
    %259 = memref.load %arg2[%c2_133, %c21_134] : memref<4x32xf32, #tpu.memory_space<smem>>
    %260 = vector.broadcast %257 : f32 to vector<1x128xf32>
    %261 = arith.mulf %0, %260 : vector<1x128xf32>
    %262 = vector.broadcast %258 : f32 to vector<1x128xf32>
    %263 = arith.addf %261, %262 : vector<1x128xf32>
    %cst_135 = arith.constant 0.000000e+00 : f32
    %264 = vector.broadcast %cst_135 : f32 to vector<1x128xf32>
    %265 = arith.maximumf %263, %264 : vector<1x128xf32>
    %266 = vector.broadcast %259 : f32 to vector<1x128xf32>
    %267 = arith.mulf %266, %265 : vector<1x128xf32>
    %268 = arith.addf %256, %267 : vector<1x128xf32>
    %c0_136 = arith.constant 0 : index
    %c22 = arith.constant 22 : index
    %269 = memref.load %arg2[%c0_136, %c22] : memref<4x32xf32, #tpu.memory_space<smem>>
    %c1_137 = arith.constant 1 : index
    %c22_138 = arith.constant 22 : index
    %270 = memref.load %arg2[%c1_137, %c22_138] : memref<4x32xf32, #tpu.memory_space<smem>>
    %c2_139 = arith.constant 2 : index
    %c22_140 = arith.constant 22 : index
    %271 = memref.load %arg2[%c2_139, %c22_140] : memref<4x32xf32, #tpu.memory_space<smem>>
    %272 = vector.broadcast %269 : f32 to vector<1x128xf32>
    %273 = arith.mulf %0, %272 : vector<1x128xf32>
    %274 = vector.broadcast %270 : f32 to vector<1x128xf32>
    %275 = arith.addf %273, %274 : vector<1x128xf32>
    %cst_141 = arith.constant 0.000000e+00 : f32
    %276 = vector.broadcast %cst_141 : f32 to vector<1x128xf32>
    %277 = arith.maximumf %275, %276 : vector<1x128xf32>
    %278 = vector.broadcast %271 : f32 to vector<1x128xf32>
    %279 = arith.mulf %278, %277 : vector<1x128xf32>
    %280 = arith.addf %268, %279 : vector<1x128xf32>
    %c0_142 = arith.constant 0 : index
    %c23 = arith.constant 23 : index
    %281 = memref.load %arg2[%c0_142, %c23] : memref<4x32xf32, #tpu.memory_space<smem>>
    %c1_143 = arith.constant 1 : index
    %c23_144 = arith.constant 23 : index
    %282 = memref.load %arg2[%c1_143, %c23_144] : memref<4x32xf32, #tpu.memory_space<smem>>
    %c2_145 = arith.constant 2 : index
    %c23_146 = arith.constant 23 : index
    %283 = memref.load %arg2[%c2_145, %c23_146] : memref<4x32xf32, #tpu.memory_space<smem>>
    %284 = vector.broadcast %281 : f32 to vector<1x128xf32>
    %285 = arith.mulf %0, %284 : vector<1x128xf32>
    %286 = vector.broadcast %282 : f32 to vector<1x128xf32>
    %287 = arith.addf %285, %286 : vector<1x128xf32>
    %cst_147 = arith.constant 0.000000e+00 : f32
    %288 = vector.broadcast %cst_147 : f32 to vector<1x128xf32>
    %289 = arith.maximumf %287, %288 : vector<1x128xf32>
    %290 = vector.broadcast %283 : f32 to vector<1x128xf32>
    %291 = arith.mulf %290, %289 : vector<1x128xf32>
    %292 = arith.addf %280, %291 : vector<1x128xf32>
    %c0_148 = arith.constant 0 : index
    %c24 = arith.constant 24 : index
    %293 = memref.load %arg2[%c0_148, %c24] : memref<4x32xf32, #tpu.memory_space<smem>>
    %c1_149 = arith.constant 1 : index
    %c24_150 = arith.constant 24 : index
    %294 = memref.load %arg2[%c1_149, %c24_150] : memref<4x32xf32, #tpu.memory_space<smem>>
    %c2_151 = arith.constant 2 : index
    %c24_152 = arith.constant 24 : index
    %295 = memref.load %arg2[%c2_151, %c24_152] : memref<4x32xf32, #tpu.memory_space<smem>>
    %296 = vector.broadcast %293 : f32 to vector<1x128xf32>
    %297 = arith.mulf %0, %296 : vector<1x128xf32>
    %298 = vector.broadcast %294 : f32 to vector<1x128xf32>
    %299 = arith.addf %297, %298 : vector<1x128xf32>
    %cst_153 = arith.constant 0.000000e+00 : f32
    %300 = vector.broadcast %cst_153 : f32 to vector<1x128xf32>
    %301 = arith.maximumf %299, %300 : vector<1x128xf32>
    %302 = vector.broadcast %295 : f32 to vector<1x128xf32>
    %303 = arith.mulf %302, %301 : vector<1x128xf32>
    %304 = arith.addf %292, %303 : vector<1x128xf32>
    %c0_154 = arith.constant 0 : index
    %c25 = arith.constant 25 : index
    %305 = memref.load %arg2[%c0_154, %c25] : memref<4x32xf32, #tpu.memory_space<smem>>
    %c1_155 = arith.constant 1 : index
    %c25_156 = arith.constant 25 : index
    %306 = memref.load %arg2[%c1_155, %c25_156] : memref<4x32xf32, #tpu.memory_space<smem>>
    %c2_157 = arith.constant 2 : index
    %c25_158 = arith.constant 25 : index
    %307 = memref.load %arg2[%c2_157, %c25_158] : memref<4x32xf32, #tpu.memory_space<smem>>
    %308 = vector.broadcast %305 : f32 to vector<1x128xf32>
    %309 = arith.mulf %0, %308 : vector<1x128xf32>
    %310 = vector.broadcast %306 : f32 to vector<1x128xf32>
    %311 = arith.addf %309, %310 : vector<1x128xf32>
    %cst_159 = arith.constant 0.000000e+00 : f32
    %312 = vector.broadcast %cst_159 : f32 to vector<1x128xf32>
    %313 = arith.maximumf %311, %312 : vector<1x128xf32>
    %314 = vector.broadcast %307 : f32 to vector<1x128xf32>
    %315 = arith.mulf %314, %313 : vector<1x128xf32>
    %316 = arith.addf %304, %315 : vector<1x128xf32>
    %c0_160 = arith.constant 0 : index
    %c26 = arith.constant 26 : index
    %317 = memref.load %arg2[%c0_160, %c26] : memref<4x32xf32, #tpu.memory_space<smem>>
    %c1_161 = arith.constant 1 : index
    %c26_162 = arith.constant 26 : index
    %318 = memref.load %arg2[%c1_161, %c26_162] : memref<4x32xf32, #tpu.memory_space<smem>>
    %c2_163 = arith.constant 2 : index
    %c26_164 = arith.constant 26 : index
    %319 = memref.load %arg2[%c2_163, %c26_164] : memref<4x32xf32, #tpu.memory_space<smem>>
    %320 = vector.broadcast %317 : f32 to vector<1x128xf32>
    %321 = arith.mulf %0, %320 : vector<1x128xf32>
    %322 = vector.broadcast %318 : f32 to vector<1x128xf32>
    %323 = arith.addf %321, %322 : vector<1x128xf32>
    %cst_165 = arith.constant 0.000000e+00 : f32
    %324 = vector.broadcast %cst_165 : f32 to vector<1x128xf32>
    %325 = arith.maximumf %323, %324 : vector<1x128xf32>
    %326 = vector.broadcast %319 : f32 to vector<1x128xf32>
    %327 = arith.mulf %326, %325 : vector<1x128xf32>
    %328 = arith.addf %316, %327 : vector<1x128xf32>
    %c0_166 = arith.constant 0 : index
    %c27 = arith.constant 27 : index
    %329 = memref.load %arg2[%c0_166, %c27] : memref<4x32xf32, #tpu.memory_space<smem>>
    %c1_167 = arith.constant 1 : index
    %c27_168 = arith.constant 27 : index
    %330 = memref.load %arg2[%c1_167, %c27_168] : memref<4x32xf32, #tpu.memory_space<smem>>
    %c2_169 = arith.constant 2 : index
    %c27_170 = arith.constant 27 : index
    %331 = memref.load %arg2[%c2_169, %c27_170] : memref<4x32xf32, #tpu.memory_space<smem>>
    %332 = vector.broadcast %329 : f32 to vector<1x128xf32>
    %333 = arith.mulf %0, %332 : vector<1x128xf32>
    %334 = vector.broadcast %330 : f32 to vector<1x128xf32>
    %335 = arith.addf %333, %334 : vector<1x128xf32>
    %cst_171 = arith.constant 0.000000e+00 : f32
    %336 = vector.broadcast %cst_171 : f32 to vector<1x128xf32>
    %337 = arith.maximumf %335, %336 : vector<1x128xf32>
    %338 = vector.broadcast %331 : f32 to vector<1x128xf32>
    %339 = arith.mulf %338, %337 : vector<1x128xf32>
    %340 = arith.addf %328, %339 : vector<1x128xf32>
    %c0_172 = arith.constant 0 : index
    %c28 = arith.constant 28 : index
    %341 = memref.load %arg2[%c0_172, %c28] : memref<4x32xf32, #tpu.memory_space<smem>>
    %c1_173 = arith.constant 1 : index
    %c28_174 = arith.constant 28 : index
    %342 = memref.load %arg2[%c1_173, %c28_174] : memref<4x32xf32, #tpu.memory_space<smem>>
    %c2_175 = arith.constant 2 : index
    %c28_176 = arith.constant 28 : index
    %343 = memref.load %arg2[%c2_175, %c28_176] : memref<4x32xf32, #tpu.memory_space<smem>>
    %344 = vector.broadcast %341 : f32 to vector<1x128xf32>
    %345 = arith.mulf %0, %344 : vector<1x128xf32>
    %346 = vector.broadcast %342 : f32 to vector<1x128xf32>
    %347 = arith.addf %345, %346 : vector<1x128xf32>
    %cst_177 = arith.constant 0.000000e+00 : f32
    %348 = vector.broadcast %cst_177 : f32 to vector<1x128xf32>
    %349 = arith.maximumf %347, %348 : vector<1x128xf32>
    %350 = vector.broadcast %343 : f32 to vector<1x128xf32>
    %351 = arith.mulf %350, %349 : vector<1x128xf32>
    %352 = arith.addf %340, %351 : vector<1x128xf32>
    %c0_178 = arith.constant 0 : index
    %c29 = arith.constant 29 : index
    %353 = memref.load %arg2[%c0_178, %c29] : memref<4x32xf32, #tpu.memory_space<smem>>
    %c1_179 = arith.constant 1 : index
    %c29_180 = arith.constant 29 : index
    %354 = memref.load %arg2[%c1_179, %c29_180] : memref<4x32xf32, #tpu.memory_space<smem>>
    %c2_181 = arith.constant 2 : index
    %c29_182 = arith.constant 29 : index
    %355 = memref.load %arg2[%c2_181, %c29_182] : memref<4x32xf32, #tpu.memory_space<smem>>
    %356 = vector.broadcast %353 : f32 to vector<1x128xf32>
    %357 = arith.mulf %0, %356 : vector<1x128xf32>
    %358 = vector.broadcast %354 : f32 to vector<1x128xf32>
    %359 = arith.addf %357, %358 : vector<1x128xf32>
    %cst_183 = arith.constant 0.000000e+00 : f32
    %360 = vector.broadcast %cst_183 : f32 to vector<1x128xf32>
    %361 = arith.maximumf %359, %360 : vector<1x128xf32>
    %362 = vector.broadcast %355 : f32 to vector<1x128xf32>
    %363 = arith.mulf %362, %361 : vector<1x128xf32>
    %364 = arith.addf %352, %363 : vector<1x128xf32>
    %c0_184 = arith.constant 0 : index
    %c30 = arith.constant 30 : index
    %365 = memref.load %arg2[%c0_184, %c30] : memref<4x32xf32, #tpu.memory_space<smem>>
    %c1_185 = arith.constant 1 : index
    %c30_186 = arith.constant 30 : index
    %366 = memref.load %arg2[%c1_185, %c30_186] : memref<4x32xf32, #tpu.memory_space<smem>>
    %c2_187 = arith.constant 2 : index
    %c30_188 = arith.constant 30 : index
    %367 = memref.load %arg2[%c2_187, %c30_188] : memref<4x32xf32, #tpu.memory_space<smem>>
    %368 = vector.broadcast %365 : f32 to vector<1x128xf32>
    %369 = arith.mulf %0, %368 : vector<1x128xf32>
    %370 = vector.broadcast %366 : f32 to vector<1x128xf32>
    %371 = arith.addf %369, %370 : vector<1x128xf32>
    %cst_189 = arith.constant 0.000000e+00 : f32
    %372 = vector.broadcast %cst_189 : f32 to vector<1x128xf32>
    %373 = arith.maximumf %371, %372 : vector<1x128xf32>
    %374 = vector.broadcast %367 : f32 to vector<1x128xf32>
    %375 = arith.mulf %374, %373 : vector<1x128xf32>
    %376 = arith.addf %364, %375 : vector<1x128xf32>
    %c0_190 = arith.constant 0 : index
    %c31 = arith.constant 31 : index
    %377 = memref.load %arg2[%c0_190, %c31] : memref<4x32xf32, #tpu.memory_space<smem>>
    %c1_191 = arith.constant 1 : index
    %c31_192 = arith.constant 31 : index
    %378 = memref.load %arg2[%c1_191, %c31_192] : memref<4x32xf32, #tpu.memory_space<smem>>
    %c2_193 = arith.constant 2 : index
    %c31_194 = arith.constant 31 : index
    %379 = memref.load %arg2[%c2_193, %c31_194] : memref<4x32xf32, #tpu.memory_space<smem>>
    %380 = vector.broadcast %377 : f32 to vector<1x128xf32>
    %381 = arith.mulf %0, %380 : vector<1x128xf32>
    %382 = vector.broadcast %378 : f32 to vector<1x128xf32>
    %383 = arith.addf %381, %382 : vector<1x128xf32>
    %cst_195 = arith.constant 0.000000e+00 : f32
    %384 = vector.broadcast %cst_195 : f32 to vector<1x128xf32>
    %385 = arith.maximumf %383, %384 : vector<1x128xf32>
    %386 = vector.broadcast %379 : f32 to vector<1x128xf32>
    %387 = arith.mulf %386, %385 : vector<1x128xf32>
    %388 = arith.addf %376, %387 : vector<1x128xf32>
    %c0_196 = arith.constant 0 : index
    %c0_197 = arith.constant 0 : index
    %389 = vector.load %arg3[%c0_196, %c0_197] : memref<1x128xf32, #tpu.memory_space<vmem>>, vector<1x128xf32>
    tpu.vector_store %arg3[%c0_196, %c0_197], %388 {strides = array<i32>} : memref<1x128xf32, #tpu.memory_space<vmem>>, vector<1x128xf32>,
    return
  }
  func.func @transform_0(%arg0: i32) -> (i32, i32) {
    %c0_i32 = arith.constant 0 : i32
    %c0_i32_0 = arith.constant 0 : i32
    return %arg0, %c0_i32 : i32, i32
  }
  func.func @transform_1(%arg0: i32) -> (i32, i32) {
    %c0_i32 = arith.constant 0 : i32
    %c0_i32_0 = arith.constant 0 : i32
    %c0_i32_1 = arith.constant 0 : i32
    return %c0_i32, %c0_i32_0 : i32, i32
  }
  func.func @transform_2(%arg0: i32) -> (i32, i32) {
    %c0_i32 = arith.constant 0 : i32
    %c0_i32_0 = arith.constant 0 : i32
    return %arg0, %c0_i32 : i32, i32
  }
}

</mosaic_0001>

<bundles_post_ra>
// kernel: net_forward.1
= control target key start
LH: loop header
LB: loop body
LE: loop exit
PB: predicated region body
PF: predicated region fallthrough
CT: control target
= control target key end

     0   :  { %7 = vsyncpa [#allocation3], 0  ;;  %s497_s12 = smov [#allocation2]   ;;  %s646_s0 = inlined_call_operand.vmem [shape: f32[1,128], index: 0, kind: input, shape index: {}]   ;;  %s647_s1 = inlined_call_operand.vmem [shape: f32[4,32], index: 1, kind: input, shape index: {}]   ;;  %s648_s2 = inlined_call_operand.vmem [shape: f32[1,128], index: 2, kind: output, shape index: {}]  }
   0x1   :  { %s15_s11 = sshll.u32 %s647_s1, 4  ;;  %s16_s11 = int_to_ptr.vmem [resolvable:$true] %s15_s11 }
   0x2   :  { %18 = dma.vmem_to_smem %s16_s11, 64, %s497_s12, [#allocation3]  }
   0x3   :  { %495 = dma.done.wait [#allocation3], 64  }
   0x4   :  { %496 = vsyncadd [#allocation3], 4294967232 }
   0x5   :  { %23 = sfence }
   0x6   :  { %s516_s13 = sld [smem:[#allocation2 + $0x180]]  ;;  %v521_v0 = vld [vmem:[%s646_s0] sm:$0x1] }
   0x7   :  { %s28_s14 = sld [smem:[#allocation2]] }
   0x8   :  { %s387_s15 = sld [smem:[#allocation2 + $0x80]] }
   0x9   :  { %s388_s16 = sld [smem:[#allocation2 + $0x100]] }
   0xa   :  { %s389_s17 = sld [smem:[#allocation2 + $0x1]] }
   0xb   :  { %s390_s20 = sld [smem:[#allocation2 + $0x81]] }
   0xc   :  { %s523_s21 = sld [smem:[#allocation2 + $0x101]]  ;;  %v26_v10 = vstv %s516_s13 }
   0xd   :  { %v31_v1 = vstv %s28_s14  ;;  %s392_s1 = sld [smem:[#allocation2 + $0x2]] }
   0xe   :  { %v32_v2 = vmul.f32 %v31_v1, %v521_v0  ;;  %v33_v3 = vstv %s387_s15  ;;  %s393_s22 = sld [smem:[#allocation2 + $0x82]] }
   0xf   :  { %s526_s23 = sld [smem:[#allocation2 + $0x102]]  ;;  %v36_v6 = vstv %s388_s16 }
  0x10   :  { %v34_v4 = vadd.f32 %v33_v3, %v32_v2  ;;  %v42_v5 = vstv %s389_s17  ;;  %s395_s24 = sld [smem:[#allocation2 + $0x3]] }
  0x11   :  { %v43_v7 = vmul.f32 %v42_v5, %v521_v0  ;;  %v44_v8 = vstv %s390_s20  ;;  %s396_s0 = sld [smem:[#allocation2 + $0x83]] }
  0x12   :  { %v35_v9 = vmax.f32 %v34_v4, 0.0  ;;  %s529_s25 = sld [smem:[#allocation2 + $0x103]]  ;;  %v47_v14 = vstv %s523_s21 }
  0x13   :  { %v45_v11 = vadd.f32 %v44_v8, %v43_v7  ;;  %v53_v12 = vstv %s392_s1  ;;  %s398_s26 = sld [smem:[#allocation2 + $0x4]] }
  0x14   :  { %v37_v13 = vmul.f32 %v36_v6, %v35_v9  ;;  %v54_v15 = vmul.f32 %v53_v12, %v521_v0  ;;  %v55_v16 = vstv %s393_s22  ;;  %s399_s27 = sld [smem:[#allocation2 + $0x84]] }
  0x15   :  { %v46_v17 = vmax.f32 %v45_v11, 0.0  ;;  %s534_s28 = sld [smem:[#allocation2 + $0x104]]  ;;  %v58_v22 = vstv %s526_s23 }
  0x16   :  { %v38_v18 = vadd.f32 %v37_v13, %v26_v10  ;;  %v56_v19 = vadd.f32 %v55_v16, %v54_v15  ;;  %v64_v20 = vstv %s395_s24  ;;  %s401_s29 = sld [smem:[#allocation2 + $0x5]] }
  0x17   :  { %v48_v21 = vmul.f32 %v47_v14, %v46_v17  ;;  %v65_v23 = vmul.f32 %v64_v20, %v521_v0  ;;  %v66_v24 = vstv %s396_s0  ;;  %s402_s30 = sld [smem:[#allocation2 + $0x85]] }
  0x18   :  { %v57_v25 = vmax.f32 %v56_v19, 0.0  ;;  %s538_s3 = sld [smem:[#allocation2 + $0x105]]  ;;  %v69_v30 = vstv %s529_s25 }
  0x19   :  { %v49_v26 = vadd.f32 %v48_v21, %v38_v18  ;;  %v67_v27 = vadd.f32 %v66_v24, %v65_v23  ;;  %v75_v28 = vstv %s398_s26  ;;  %s404_s4 = sld [smem:[#allocation2 + $0x6]] }
  0x1a   :  { %v59_v29 = vmul.f32 %v58_v22, %v57_v25  ;;  %v76_v31 = vmul.f32 %v75_v28, %v521_v0  ;;  %v77_v32 = vstv %s399_s27  ;;  %s405_s5 = sld [smem:[#allocation2 + $0x86]] }
  0x1b   :  { %v68_v33 = vmax.f32 %v67_v27, 0.0  ;;  %s542_s6 = sld [smem:[#allocation2 + $0x106]]  ;;  %v80_v38 = vstv %s534_s28 }
  0x1c   :  { %v60_v34 = vadd.f32 %v59_v29, %v49_v26  ;;  %v78_v35 = vadd.f32 %v77_v32, %v76_v31  ;;  %v86_v36 = vstv %s401_s29  ;;  %s407_s7 = sld [smem:[#allocation2 + $0x7]] }
  0x1d   :  { %v70_v37 = vmul.f32 %v69_v30, %v68_v33  ;;  %v87_v39 = vmul.f32 %v86_v36, %v521_v0  ;;  %v88_v40 = vstv %s402_s30  ;;  %s408_s8 = sld [smem:[#allocation2 + $0x87]] }
  0x1e   :  { %v79_v41 = vmax.f32 %v78_v35, 0.0  ;;  %s546_s9 = sld [smem:[#allocation2 + $0x107]]  ;;  %v91_v46 = vstv %s538_s3 }
  0x1f   :  { %v71_v42 = vadd.f32 %v70_v37, %v60_v34  ;;  %v89_v43 = vadd.f32 %v88_v40, %v87_v39  ;;  %v97_v44 = vstv %s404_s4  ;;  %s410_s10 = sld [smem:[#allocation2 + $0x8]] }
  0x20   :  { %v81_v45 = vmul.f32 %v80_v38, %v79_v41  ;;  %v98_v47 = vmul.f32 %v97_v44, %v521_v0  ;;  %v99_v48 = vstv %s405_s5  ;;  %s411_s11 = sld [smem:[#allocation2 + $0x88]] }
  0x21   :  { %v90_v49 = vmax.f32 %v89_v43, 0.0  ;;  %s550_s12 = sld [smem:[#allocation2 + $0x108]]  ;;  %v102_v54 = vstv %s542_s6 }
  0x22   :  { %v82_v50 = vadd.f32 %v81_v45, %v71_v42  ;;  %v100_v51 = vadd.f32 %v99_v48, %v98_v47  ;;  %v108_v52 = vstv %s407_s7  ;;  %s413_s13 = sld [smem:[#allocation2 + $0x9]] }
  0x23   :  { %v92_v53 = vmul.f32 %v91_v46, %v90_v49  ;;  %v109_v55 = vmul.f32 %v108_v52, %v521_v0  ;;  %v110_v56 = vstv %s408_s8  ;;  %s414_s14 = sld [smem:[#allocation2 + $0x89]] }
  0x24   :  { %v101_v57 = vmax.f32 %v100_v51, 0.0  ;;  %s554_s15 = sld [smem:[#allocation2 + $0x109]]  ;;  %v113_v62 = vstv %s546_s9 }
  0x25   :  { %v93_v58 = vadd.f32 %v92_v53, %v82_v50  ;;  %v111_v59 = vadd.f32 %v110_v56, %v109_v55  ;;  %v119_v60 = vstv %s410_s10  ;;  %s416_s16 = sld [smem:[#allocation2 + $0xa]] }
  0x26   :  { %v103_v61 = vmul.f32 %v102_v54, %v101_v57  ;;  %v120_v63 = vmul.f32 %v119_v60, %v521_v0  ;;  %v121_v1 = vstv %s411_s11  ;;  %s417_s17 = sld [smem:[#allocation2 + $0x8a]] }
  0x27   :  { %v112_v2 = vmax.f32 %v111_v59, 0.0  ;;  %s558_s18 = sld [smem:[#allocation2 + $0x10a]]  ;;  %v124_v7 = vstv %s550_s12 }
  0x28   :  { %v104_v3 = vadd.f32 %v103_v61, %v93_v58  ;;  %v122_v4 = vadd.f32 %v121_v1, %v120_v63  ;;  %v130_v5 = vstv %s413_s13  ;;  %s419_s19 = sld [smem:[#allocation2 + $0xb]] }
  0x29   :  { %v114_v6 = vmul.f32 %v113_v62, %v112_v2  ;;  %v131_v8 = vmul.f32 %v130_v5, %v521_v0  ;;  %v132_v9 = vstv %s414_s14  ;;  %s420_s20 = sld [smem:[#allocation2 + $0x8b]] }
  0x2a   :  { %v123_v10 = vmax.f32 %v122_v4, 0.0  ;;  %s562_s21 = sld [smem:[#allocation2 + $0x10b]]  ;;  %v135_v15 = vstv %s554_s15 }
  0x2b   :  { %v115_v11 = vadd.f32 %v114_v6, %v104_v3  ;;  %v133_v12 = vadd.f32 %v132_v9, %v131_v8  ;;  %v141_v13 = vstv %s416_s16  ;;  %s422_s1 = sld [smem:[#allocation2 + $0xc]] }
  0x2c   :  { %v125_v14 = vmul.f32 %v124_v7, %v123_v10  ;;  %v142_v16 = vmul.f32 %v141_v13, %v521_v0  ;;  %v143_v17 = vstv %s417_s17  ;;  %s423_s22 = sld [smem:[#allocation2 + $0x8c]] }
  0x2d   :  { %v134_v18 = vmax.f32 %v133_v12, 0.0  ;;  %s566_s23 = sld [smem:[#allocation2 + $0x10c]]  ;;  %v146_v23 = vstv %s558_s18 }
  0x2e   :  { %v126_v19 = vadd.f32 %v125_v14, %v115_v11  ;;  %v144_v20 = vadd.f32 %v143_v17, %v142_v16  ;;  %v152_v21 = vstv %s419_s19  ;;  %s425_s24 = sld [smem:[#allocation2 + $0xd]] }
  0x2f   :  { %v136_v22 = vmul.f32 %v135_v15, %v134_v18  ;;  %v153_v24 = vmul.f32 %v152_v21, %v521_v0  ;;  %v154_v25 = vstv %s420_s20  ;;  %s426_s0 = sld [smem:[#allocation2 + $0x8d]] }
  0x30   :  { %v145_v26 = vmax.f32 %v144_v20, 0.0  ;;  %s570_s25 = sld [smem:[#allocation2 + $0x10d]]  ;;  %v157_v31 = vstv %s562_s21 }
  0x31   :  { %v137_v27 = vadd.f32 %v136_v22, %v126_v19  ;;  %v155_v28 = vadd.f32 %v154_v25, %v153_v24  ;;  %v163_v29 = vstv %s422_s1  ;;  %s428_s26 = sld [smem:[#allocation2 + $0xe]] }
  0x32   :  { %v147_v30 = vmul.f32 %v146_v23, %v145_v26  ;;  %v164_v32 = vmul.f32 %v163_v29, %v521_v0  ;;  %v165_v33 = vstv %s423_s22  ;;  %s429_s27 = sld [smem:[#allocation2 + $0x8e]] }
  0x33   :  { %v156_v34 = vmax.f32 %v155_v28, 0.0  ;;  %s574_s28 = sld [smem:[#allocation2 + $0x10e]]  ;;  %v168_v39 = vstv %s566_s23 }
  0x34   :  { %v148_v35 = vadd.f32 %v147_v30, %v137_v27  ;;  %v166_v36 = vadd.f32 %v165_v33, %v164_v32  ;;  %v174_v37 = vstv %s425_s24  ;;  %s431_s29 = sld [smem:[#allocation2 + $0xf]] }
  0x35   :  { %v158_v38 = vmul.f32 %v157_v31, %v156_v34  ;;  %v175_v40 = vmul.f32 %v174_v37, %v521_v0  ;;  %v176_v41 = vstv %s426_s0  ;;  %s432_s30 = sld [smem:[#allocation2 + $0x8f]] }
  0x36   :  { %v167_v42 = vmax.f32 %v166_v36, 0.0  ;;  %s578_s3 = sld [smem:[#allocation2 + $0x10f]]  ;;  %v179_v47 = vstv %s570_s25 }
  0x37   :  { %v159_v43 = vadd.f32 %v158_v38, %v148_v35  ;;  %v177_v44 = vadd.f32 %v176_v41, %v175_v40  ;;  %v185_v45 = vstv %s428_s26  ;;  %s434_s4 = sld [smem:[#allocation2 + $0x10]] }
  0x38   :  { %v169_v46 = vmul.f32 %v168_v39, %v167_v42  ;;  %v186_v48 = vmul.f32 %v185_v45, %v521_v0  ;;  %v187_v49 = vstv %s429_s27  ;;  %s435_s5 = sld [smem:[#allocation2 + $0x90]] }
  0x39   :  { %v178_v50 = vmax.f32 %v177_v44, 0.0  ;;  %s582_s6 = sld [smem:[#allocation2 + $0x110]]  ;;  %v190_v55 = vstv %s574_s28 }
  0x3a   :  { %v170_v51 = vadd.f32 %v169_v46, %v159_v43  ;;  %v188_v52 = vadd.f32 %v187_v49, %v186_v48  ;;  %v196_v53 = vstv %s431_s29  ;;  %s437_s7 = sld [smem:[#allocation2 + $0x11]] }
  0x3b   :  { %v180_v54 = vmul.f32 %v179_v47, %v178_v50  ;;  %v197_v56 = vmul.f32 %v196_v53, %v521_v0  ;;  %v198_v57 = vstv %s432_s30  ;;  %s438_s8 = sld [smem:[#allocation2 + $0x91]] }
  0x3c   :  { %v189_v58 = vmax.f32 %v188_v52, 0.0  ;;  %s586_s9 = sld [smem:[#allocation2 + $0x111]]  ;;  %v201_v63 = vstv %s578_s3 }
  0x3d   :  { %v181_v59 = vadd.f32 %v180_v54, %v170_v51  ;;  %v199_v60 = vadd.f32 %v198_v57, %v197_v56  ;;  %v207_v61 = vstv %s434_s4  ;;  %s440_s10 = sld [smem:[#allocation2 + $0x12]] }
  0x3e   :  { %v191_v62 = vmul.f32 %v190_v55, %v189_v58  ;;  %v208_v1 = vmul.f32 %v207_v61, %v521_v0  ;;  %v209_v2 = vstv %s435_s5  ;;  %s441_s11 = sld [smem:[#allocation2 + $0x92]] }
  0x3f   :  { %v200_v3 = vmax.f32 %v199_v60, 0.0  ;;  %s590_s12 = sld [smem:[#allocation2 + $0x112]]  ;;  %v212_v8 = vstv %s582_s6 }
  0x40   :  { %v192_v4 = vadd.f32 %v191_v62, %v181_v59  ;;  %v210_v5 = vadd.f32 %v209_v2, %v208_v1  ;;  %v218_v6 = vstv %s437_s7  ;;  %s443_s13 = sld [smem:[#allocation2 + $0x13]] }
  0x41   :  { %v202_v7 = vmul.f32 %v201_v63, %v200_v3  ;;  %v219_v9 = vmul.f32 %v218_v6, %v521_v0  ;;  %v220_v10 = vstv %s438_s8  ;;  %s444_s14 = sld [smem:[#allocation2 + $0x93]] }
  0x42   :  { %v211_v11 = vmax.f32 %v210_v5, 0.0  ;;  %s594_s15 = sld [smem:[#allocation2 + $0x113]]  ;;  %v223_v16 = vstv %s586_s9 }
  0x43   :  { %v203_v12 = vadd.f32 %v202_v7, %v192_v4  ;;  %v221_v13 = vadd.f32 %v220_v10, %v219_v9  ;;  %v229_v14 = vstv %s440_s10  ;;  %s446_s16 = sld [smem:[#allocation2 + $0x14]] }
  0x44   :  { %v213_v15 = vmul.f32 %v212_v8, %v211_v11  ;;  %v230_v17 = vmul.f32 %v229_v14, %v521_v0  ;;  %v231_v18 = vstv %s441_s11  ;;  %s447_s17 = sld [smem:[#allocation2 + $0x94]] }
  0x45   :  { %v222_v19 = vmax.f32 %v221_v13, 0.0  ;;  %s598_s18 = sld [smem:[#allocation2 + $0x114]]  ;;  %v234_v24 = vstv %s590_s12 }
  0x46   :  { %v214_v20 = vadd.f32 %v213_v15, %v203_v12  ;;  %v232_v21 = vadd.f32 %v231_v18, %v230_v17  ;;  %v240_v22 = vstv %s443_s13  ;;  %s449_s19 = sld [smem:[#allocation2 + $0x15]] }
  0x47   :  { %v224_v23 = vmul.f32 %v223_v16, %v222_v19  ;;  %v241_v25 = vmul.f32 %v240_v22, %v521_v0  ;;  %v242_v26 = vstv %s444_s14  ;;  %s450_s20 = sld [smem:[#allocation2 + $0x95]] }
  0x48   :  { %v233_v27 = vmax.f32 %v232_v21, 0.0  ;;  %s602_s21 = sld [smem:[#allocation2 + $0x115]]  ;;  %v245_v32 = vstv %s594_s15 }
  0x49   :  { %v225_v28 = vadd.f32 %v224_v23, %v214_v20  ;;  %v243_v29 = vadd.f32 %v242_v26, %v241_v25  ;;  %v251_v30 = vstv %s446_s16  ;;  %s452_s1 = sld [smem:[#allocation2 + $0x16]] }
  0x4a   :  { %v235_v31 = vmul.f32 %v234_v24, %v233_v27  ;;  %v252_v33 = vmul.f32 %v251_v30, %v521_v0  ;;  %v253_v34 = vstv %s447_s17  ;;  %s453_s22 = sld [smem:[#allocation2 + $0x96]] }
  0x4b   :  { %v244_v35 = vmax.f32 %v243_v29, 0.0  ;;  %s606_s23 = sld [smem:[#allocation2 + $0x116]]  ;;  %v256_v40 = vstv %s598_s18 }
  0x4c   :  { %v236_v36 = vadd.f32 %v235_v31, %v225_v28  ;;  %v254_v37 = vadd.f32 %v253_v34, %v252_v33  ;;  %v262_v38 = vstv %s449_s19  ;;  %s455_s24 = sld [smem:[#allocation2 + $0x17]] }
  0x4d   :  { %v246_v39 = vmul.f32 %v245_v32, %v244_v35  ;;  %v263_v41 = vmul.f32 %v262_v38, %v521_v0  ;;  %v264_v42 = vstv %s450_s20  ;;  %s456_s0 = sld [smem:[#allocation2 + $0x97]] }
  0x4e   :  { %v255_v43 = vmax.f32 %v254_v37, 0.0  ;;  %s610_s25 = sld [smem:[#allocation2 + $0x117]]  ;;  %v267_v48 = vstv %s602_s21 }
  0x4f   :  { %v247_v44 = vadd.f32 %v246_v39, %v236_v36  ;;  %v265_v45 = vadd.f32 %v264_v42, %v263_v41  ;;  %v273_v46 = vstv %s452_s1  ;;  %s458_s26 = sld [smem:[#allocation2 + $0x18]] }
  0x50   :  { %v257_v47 = vmul.f32 %v256_v40, %v255_v43  ;;  %v274_v49 = vmul.f32 %v273_v46, %v521_v0  ;;  %v275_v50 = vstv %s453_s22  ;;  %s459_s27 = sld [smem:[#allocation2 + $0x98]] }
  0x51   :  { %v266_v51 = vmax.f32 %v265_v45, 0.0  ;;  %s614_s28 = sld [smem:[#allocation2 + $0x118]]  ;;  %v278_v56 = vstv %s606_s23 }
  0x52   :  { %v258_v52 = vadd.f32 %v257_v47, %v247_v44  ;;  %v276_v53 = vadd.f32 %v275_v50, %v274_v49  ;;  %v284_v54 = vstv %s455_s24  ;;  %s461_s29 = sld [smem:[#allocation2 + $0x19]] }
  0x53   :  { %v268_v55 = vmul.f32 %v267_v48, %v266_v51  ;;  %v285_v57 = vmul.f32 %v284_v54, %v521_v0  ;;  %v286_v58 = vstv %s456_s0  ;;  %s462_s30 = sld [smem:[#allocation2 + $0x99]] }
  0x54   :  { %v277_v59 = vmax.f32 %v276_v53, 0.0  ;;  %s618_s3 = sld [smem:[#allocation2 + $0x119]]  ;;  %v289_v1 = vstv %s610_s25 }
  0x55   :  { %v269_v60 = vadd.f32 %v268_v55, %v258_v52  ;;  %v287_v61 = vadd.f32 %v286_v58, %v285_v57  ;;  %v295_v62 = vstv %s458_s26  ;;  %s464_s4 = sld [smem:[#allocation2 + $0x1a]] }
  0x56   :  { %v279_v63 = vmul.f32 %v278_v56, %v277_v59  ;;  %v296_v2 = vmul.f32 %v295_v62, %v521_v0  ;;  %v297_v3 = vstv %s459_s27  ;;  %s465_s5 = sld [smem:[#allocation2 + $0x9a]] }
  0x57   :  { %v288_v4 = vmax.f32 %v287_v61, 0.0  ;;  %s622_s6 = sld [smem:[#allocation2 + $0x11a]]  ;;  %v300_v9 = vstv %s614_s28 }
  0x58   :  { %v280_v5 = vadd.f32 %v279_v63, %v269_v60  ;;  %v298_v6 = vadd.f32 %v297_v3, %v296_v2  ;;  %v306_v7 = vstv %s461_s29  ;;  %s467_s7 = sld [smem:[#allocation2 + $0x1b]] }
  0x59   :  { %v290_v8 = vmul.f32 %v289_v1, %v288_v4  ;;  %v307_v10 = vmul.f32 %v306_v7, %v521_v0  ;;  %v308_v11 = vstv %s462_s30  ;;  %s468_s8 = sld [smem:[#allocation2 + $0x9b]] }
  0x5a   :  { %v299_v12 = vmax.f32 %v298_v6, 0.0  ;;  %s626_s9 = sld [smem:[#allocation2 + $0x11b]]  ;;  %v311_v17 = vstv %s618_s3 }
  0x5b   :  { %v291_v13 = vadd.f32 %v290_v8, %v280_v5  ;;  %v309_v14 = vadd.f32 %v308_v11, %v307_v10  ;;  %v317_v15 = vstv %s464_s4  ;;  %s470_s10 = sld [smem:[#allocation2 + $0x1c]] }
  0x5c   :  { %v301_v16 = vmul.f32 %v300_v9, %v299_v12  ;;  %v318_v18 = vmul.f32 %v317_v15, %v521_v0  ;;  %v319_v19 = vstv %s465_s5  ;;  %s471_s11 = sld [smem:[#allocation2 + $0x9c]] }
  0x5d   :  { %v310_v20 = vmax.f32 %v309_v14, 0.0  ;;  %s630_s12 = sld [smem:[#allocation2 + $0x11c]]  ;;  %v322_v25 = vstv %s622_s6 }
  0x5e   :  { %v302_v21 = vadd.f32 %v301_v16, %v291_v13  ;;  %v320_v22 = vadd.f32 %v319_v19, %v318_v18  ;;  %v328_v23 = vstv %s467_s7  ;;  %s473_s13 = sld [smem:[#allocation2 + $0x1d]] }
  0x5f   :  { %v312_v24 = vmul.f32 %v311_v17, %v310_v20  ;;  %v329_v26 = vmul.f32 %v328_v23, %v521_v0  ;;  %v330_v27 = vstv %s468_s8  ;;  %s474_s14 = sld [smem:[#allocation2 + $0x9d]] }
  0x60   :  { %v321_v28 = vmax.f32 %v320_v22, 0.0  ;;  %s634_s15 = sld [smem:[#allocation2 + $0x11d]]  ;;  %v333_v33 = vstv %s626_s9 }
  0x61   :  { %v313_v29 = vadd.f32 %v312_v24, %v302_v21  ;;  %v331_v30 = vadd.f32 %v330_v27, %v329_v26  ;;  %v339_v31 = vstv %s470_s10  ;;  %s476_s16 = sld [smem:[#allocation2 + $0x1e]] }
  0x62   :  { %v323_v32 = vmul.f32 %v322_v25, %v321_v28  ;;  %v340_v34 = vmul.f32 %v339_v31, %v521_v0  ;;  %v341_v35 = vstv %s471_s11  ;;  %s477_s17 = sld [smem:[#allocation2 + $0x9e]] }
  0x63   :  { %v332_v36 = vmax.f32 %v331_v30, 0.0  ;;  %s478_s18 = sld [smem:[#allocation2 + $0x11e]]  ;;  %v344_v41 = vstv %s630_s12 }
  0x64   :  { %v324_v37 = vadd.f32 %v323_v32, %v313_v29  ;;  %v342_v38 = vadd.f32 %v341_v35, %v340_v34  ;;  %v350_v39 = vstv %s473_s13  ;;  %s479_s19 = sld [smem:[#allocation2 + $0x1f]] }
  0x65   :  { %v334_v40 = vmul.f32 %v333_v33, %v332_v36  ;;  %v351_v42 = vmul.f32 %v350_v39, %v521_v0  ;;  %v352_v43 = vstv %s474_s14  ;;  %s480_s20 = sld [smem:[#allocation2 + $0x9f]] }
  0x66   :  { %v343_v44 = vmax.f32 %v342_v38, 0.0  ;;  %s481_s21 = sld [smem:[#allocation2 + $0x11f]]  ;;  %v355_v49 = vstv %s634_s15 }
  0x67   :  { %v335_v45 = vadd.f32 %v334_v40, %v324_v37  ;;  %v353_v46 = vadd.f32 %v352_v43, %v351_v42  ;;  %v361_v47 = vstv %s476_s16 }
  0x68   :  { %v345_v48 = vmul.f32 %v344_v41, %v343_v44  ;;  %v362_v50 = vmul.f32 %v361_v47, %v521_v0  ;;  %v363_v51 = vstv %s477_s17 }
  0x69   :  { %v354_v52 = vmax.f32 %v353_v46, 0.0  ;;  %v366_v57 = vstv %s478_s18 }
  0x6a   :  { %v346_v53 = vadd.f32 %v345_v48, %v335_v45  ;;  %v364_v54 = vadd.f32 %v363_v51, %v362_v50  ;;  %v372_v55 = vstv %s479_s19 }
  0x6b   :  { %v356_v56 = vmul.f32 %v355_v49, %v354_v52  ;;  %v373_v58 = vmul.f32 %v372_v55, %v521_v0  ;;  %v374_v59 = vstv %s480_s20 }
  0x6c   :  { %v365_v60 = vmax.f32 %v364_v54, 0.0  ;;  %v377_v1 = vstv %s481_s21 }
  0x6d   :  { %v357_v61 = vadd.f32 %v356_v56, %v346_v53  ;;  %v375_v62 = vadd.f32 %v374_v59, %v373_v58 }
  0x6e   :  { %v367_v63 = vmul.f32 %v366_v57, %v365_v60 }
  0x6f   :  { %v376_v2 = vmax.f32 %v375_v62, 0.0 }
  0x70   :  { %v368_v3 = vadd.f32 %v367_v63, %v357_v61 }
  0x71   :  { %v378_v4 = vmul.f32 %v377_v1, %v376_v2 }
  0x73   :  { %v379_v5 = vadd.f32 %v378_v4, %v368_v3 }
  0x75   :  { %380 = vst [vmem:[%s648_s2] sm:$0x1] %v379_v5 }
  0x76   :  { %385 = vsyncpa [#allocation3], 1 }

</bundles_post_ra>
